<compile_context>
chip_gen: v7x
topology: tpu7x:2x2x1
jax: 0.10.0
libtpu: 0.0.40
codegen_flags: <defaults>
</compile_context>

<pallas_src>
import functools

import jax
import jax.numpy as jnp
from jax.experimental import pallas as pl
from jax.experimental.pallas import tpu as pltpu


def _round_up(x, m):
    return ((x + m - 1) // m) * m


def _cdiv(a, b):
    return (a + b - 1) // b


def _tpu_generation():
    """Best-effort chip-generation detection (used only for tuning knobs)."""
    try:
        kind = jax.devices()[0].device_kind.lower()
    except Exception:  # pragma: no cover - never fail tile selection on this.
        kind = ""
    if "v7" in kind:
        return "v7x"
    if "v5 lite" in kind or "v5e" in kind or "v5litepod" in kind:
        return "v5e"
    if "v6" in kind:
        return "v6e"
    return "other"


# v5e MXU is 128 wide (384-wide tiles are fine); v6e/v7x MXU is 256 wide, so
# prefer 256-multiples there.
_TN_CANDIDATES_V5E = (1024, 512, 384, 256, 128)
_TN_CANDIDATES = (1024, 512, 256, 128)
_TK_CANDIDATES = (2048, 1024, 512, 256, 128)
_TM_CAP = 512


def prepare_replicated_linear_weight(weight):
    """One-time (weight-load time) prep of the PyTorch [N, K] weight.

    Transposes to [K, N] (canonical MXU feed, no in-kernel transpose) and
    zero-pads K to a multiple of 128 so the reduction dimension never contains
    unspecified data.
    """
    n, k = weight.shape
    kp = _round_up(k, 128)
    w_kn = jnp.transpose(weight)            # [K, N]
    if kp != k:
        w_kn = jnp.pad(w_kn, ((0, kp - k), (0, 0)))
    return w_kn


def _select_tiles(M, N, Kp, isz_x, isz_w, isz_o, add_bias, gen):
    """Pick (tm, tn, tk) under the generation-specific VMEM budget."""
    tn_cands = _TN_CANDIDATES_V5E if gen == "v5e" else _TN_CANDIDATES

    # --- tm: full M if it fits, otherwise the cap (multiple of 8) ---
    tm = M if M <= _TM_CAP else _TM_CAP

    # --- tn: lane-dense (multiple of 128) or the full N dim ---
    if N < 128:
        tn = N
    else:
        divisors = [c for c in tn_cands if c <= N and N % c == 0]
        tn = divisors[0] if divisors else max(c for c in tn_cands if c <= N)

    # --- tk: must evenly cover Kp (reduction dim => no ragged K blocks) ---
    if Kp <= _TK_CANDIDATES[0]:
        tk = Kp
    else:
        tk = 128
        for c in _TK_CANDIDATES:
            if Kp % c == 0:
                tk = c
                break

    # v7x only (2 TensorCores/chip): if there is a single output tile, split it
    # so the second core gets work; prefer splitting M (keeps the weight tile
    # at full lane-dense width).
    if gen == "v7x" and _cdiv(M, tm) * _cdiv(N, tn) == 1:
        if tm >= 16 and (tm // 2) % 8 == 0:
            tm //= 2
        elif tn >= 256 and (tn // 2) % 128 == 0:
            tn //= 2

    # --- VMEM budget (double-buffered in/out + f32 accumulator) ---
    budget = (48 << 20) if gen == "v7x" else (96 << 20)

    def footprint(tm_, tn_, tk_):
        f = (2 * tm_ * tk_ * isz_x          # x tiles (double-buffered)
             + 2 * tk_ * tn_ * isz_w        # weight tiles
             + 2 * tm_ * tn_ * isz_o)       # output tiles
        if Kp // tk_ > 1:
            f += tm_ * tn_ * 4              # accumulator scratch
        if add_bias:
            f += 2 * tn_ * isz_w
        return f

    def shrink_tk(t):
        for c in _TK_CANDIDATES:
            if c < t and Kp % c == 0:
                return c
        return 128

    while footprint(tm, tn, tk) > budget and tk > 128:
        tk = shrink_tk(tk)
    while footprint(tm, tn, tk) > budget and tn >= 256 and (tn // 2) % 128 == 0:
        tn //= 2

    # Tiling-rule sanity (last two block dims must be (8,128)-multiples or the
    # full array dim; K blocks must tile Kp exactly).
    assert tk == Kp or (tk % 128 == 0 and Kp % tk == 0)
    assert tn == N or tn % 128 == 0
    assert tm == M or tm % 8 == 0

    return tm, tn, tk, footprint(tm, tn, tk), budget


def _linear_kernel(*refs, add_bias, multi_k):
    """One (tm, tn) output tile; optional reduction over the K grid axis."""
    if add_bias:
        x_ref, w_ref, b_ref, *rest = refs
    else:
        x_ref, w_ref, *rest = refs
        b_ref = None
    if multi_k:
        o_ref, acc_ref = rest
    else:
        (o_ref,) = rest

    # x tile [tm, tk] @ weight tile [tk, tn] -> [tm, tn] (canonical MXU feed).
    partial = jnp.dot(x_ref[...], w_ref[...], preferred_element_type=jnp.float32)

    def _store(acc):
        if add_bias:
            acc = acc + b_ref[...].astype(jnp.float32)
        o_ref[...] = acc.astype(o_ref.dtype)

    if multi_k:
        k = pl.program_id(2)
        nk = pl.num_programs(2)

        @pl.when(k == 0)
        def _():
            acc_ref[...] = partial            # no zero-init store

        @pl.when(jnp.logical_and(k > 0, k < nk - 1))
        def _():
            acc_ref[...] += partial

        @pl.when(k == nk - 1)
        def _():
            _store(acc_ref[...] + partial)    # fused final add, no acc round-trip
    else:
        _store(partial)


def replicated_linear(x, weight_kn, bias=None, *, skip_bias_add=False):
    """Pallas implementation of ReplicatedLinear.forward.

    Args:
      x:         [..., K] activations.
      weight_kn: [Kp, N] weight prepared once by prepare_replicated_linear_weight
                 (transposed from the PyTorch [N, K] layout, K zero-padded).
      bias:      [N] parameter or None.
      skip_bias_add: if True, do not add bias; return it as the second output.

    Returns:
      (output [..., N], output_bias)  -- matching the PyTorch module.
    """
    orig_shape = x.shape
    K = orig_shape[-1]
    x2 = x.reshape(-1, K)
    M = x2.shape[0]
    Kp, N = weight_kn.shape
    assert Kp % 128 == 0 and Kp >= K, (
        "weight must be prepared with prepare_replicated_linear_weight")
    if bias is not None:
        assert bias.shape == (N,)

    add_bias = (bias is not None) and (not skip_bias_add)

    # Only the reduction (K) dim needs zero padding: garbage in ragged M/N
    # blocks only lands in masked-out output rows/cols.
    if Kp != K:
        x2 = jnp.pad(x2, ((0, 0), (0, Kp - K)))

    isz_x = jnp.dtype(x.dtype).itemsize
    isz_w = jnp.dtype(weight_kn.dtype).itemsize
    isz_o = isz_x

    gen = _tpu_generation()
    tm, tn, tk, footprint, budget = _select_tiles(
        M, N, Kp, isz_x, isz_w, isz_o, add_bias, gen)

    gm, gn, gk = _cdiv(M, tm), _cdiv(N, tn), Kp // tk
    multi_k = gk > 1

    inputs = [x2, weight_kn]
    if multi_k:
        grid = (gm, gn, gk)
        semantics = ("parallel", "parallel", "arbitrary")
        in_specs = [
            pl.BlockSpec((tm, tk), lambda i, j, k: (i, k)),
            # TODO(synk): on v7x decode (tiny M) a pipeline_mode=pl.Buffered(3)
            # weight spec can hide DMA issue latency; left at default depth.
            pl.BlockSpec((tk, tn), lambda i, j, k: (k, j)),
        ]
        out_spec = pl.BlockSpec((tm, tn), lambda i, j, k: (i, j))
        scratch = [pltpu.VMEM((tm, tn), jnp.float32)]
        if add_bias:
            in_specs.append(pl.BlockSpec((1, tn), lambda i, j, k: (0, j)))
    else:
        grid = (gm, gn)
        semantics = ("parallel", "parallel")
        in_specs = [
            pl.BlockSpec((tm, tk), lambda i, j: (i, 0)),
            pl.BlockSpec((tk, tn), lambda i, j: (0, j)),
        ]
        out_spec = pl.BlockSpec((tm, tn), lambda i, j: (i, j))
        scratch = []
        if add_bias:
            in_specs.append(pl.BlockSpec((1, tn), lambda i, j: (0, j)))
    if add_bias:
        inputs.append(bias.reshape(1, N))

    kernel = functools.partial(_linear_kernel, add_bias=add_bias, multi_k=multi_k)

    # HBM traffic including re-streaming (x is read gn times, W gm times).
    bytes_accessed = gn * M * Kp * isz_x + gm * Kp * N * isz_w + M * N * isz_o
    if add_bias:
        bytes_accessed += gm * N * isz_w

    vmem_limit = int(min(budget, max(32 << 20, footprint + (8 << 20))))

    out = pl.pallas_call(
        kernel,
        out_shape=jax.ShapeDtypeStruct((M, N), x.dtype),
        grid_spec=pltpu.PrefetchScalarGridSpec(
            num_scalar_prefetch=0,
            grid=grid,
            in_specs=in_specs,
            out_specs=out_spec,
            scratch_shapes=scratch,
        ),
        compiler_params=pltpu.CompilerParams(
            dimension_semantics=semantics,
            vmem_limit_bytes=vmem_limit,
        ),
        cost_estimate=pl.CostEstimate(
            flops=2 * M * N * Kp,
            transcendentals=0,
            bytes_accessed=int(bytes_accessed),
        ),
    )(*inputs)

    out = out.reshape(orig_shape[:-1] + (N,))
    output_bias = bias if skip_bias_add else None
    return out, output_bias


if __name__ == "__main__":
    # Module config: input_size=32, output_size=64, bias=True, params_dtype=f32.
    input_size = 32
    output_size = 64
    seq = 8  # number of tokens (M)

    key = jax.random.PRNGKey(0)
    kx, kw, kb = jax.random.split(key, 3)

    x = jax.random.normal(kx, (seq, input_size), dtype=jnp.float32)
    weight = jax.random.normal(kw, (output_size, input_size), dtype=jnp.float32) * 0.02
    bias = jax.random.normal(kb, (output_size,), dtype=jnp.float32) * 0.02

    # One-time weight prep (equivalent of weight-load time in the real model).
    w_kn = jax.block_until_ready(prepare_replicated_linear_weight(weight))

    # 1) bias-added path (single K step, lane-dense full-dim tiles).
    out, out_bias = replicated_linear(x, w_kn, bias, skip_bias_add=False)
    out = jax.block_until_ready(out)
    ref = x @ weight.T + bias
    assert out.shape == (seq, output_size)
    assert out_bias is None
    assert jnp.allclose(out, ref, atol=5e-3, rtol=5e-3)

    # 2) skip_bias_add path (bias returned, not added; no bias DMA in-kernel).
    out2, out_bias2 = replicated_linear(x, w_kn, bias, skip_bias_add=True)
    out2 = jax.block_until_ready(out2)
    assert jnp.allclose(out2, x @ weight.T, atol=5e-3, rtol=5e-3)
    assert out_bias2 is bias

    # 3) K-tiled path (exercises the accumulator / reduction grid axis).
    K_big = 4096
    kx2, kw2 = jax.random.split(kx)
    x_big = jax.random.normal(kx2, (seq, K_big), dtype=jnp.float32)
    w_big = jax.random.normal(kw2, (output_size, K_big), dtype=jnp.float32) * 0.02
    w_big_kn = prepare_replicated_linear_weight(w_big)
    out3, _ = replicated_linear(x_big, w_big_kn, bias, skip_bias_add=False)
    out3 = jax.block_until_ready(out3)
    ref3 = x_big @ w_big.T + bias
    assert jnp.allclose(out3, ref3, atol=2e-2, rtol=5e-3)

    # 4) ragged M/N + leading batch dims (exercises partial blocks / masked
    #    writeback instead of wrapper-side padding + slicing).
    B, S, K_r, N_r = 2, 7, 96, 200
    kx3, kw3, kb3 = jax.random.split(kw, 3)
    x_r = jax.random.normal(kx3, (B, S, K_r), dtype=jnp.float32)
    w_r = jax.random.normal(kw3, (N_r, K_r), dtype=jnp.float32) * 0.02
    b_r = jax.random.normal(kb3, (N_r,), dtype=jnp.float32) * 0.02
    w_r_kn = prepare_replicated_linear_weight(w_r)
    out4, _ = replicated_linear(x_r, w_r_kn, b_r, skip_bias_add=False)
    out4 = jax.block_until_ready(out4)
    ref4 = jnp.einsum("bsk,nk->bsn", x_r, w_r) + b_r
    assert out4.shape == (B, S, N_r)
    assert jnp.allclose(out4, ref4, atol=5e-3, rtol=5e-3)

    print("KERNEL_OK")
</pallas_src>

<mosaic_0001>
module attributes {stable_mosaic.version = 11 : i64} {
  func.func @_linear_kernel(%arg0: i32, %arg1: i32, %arg2: memref<8x128xf32, #tpu.memory_space<vmem>>, %arg3: memref<128x64xf32, #tpu.memory_space<vmem>>, %arg4: memref<1x64xf32, #tpu.memory_space<vmem>>, %arg5: memref<8x64xf32, #tpu.memory_space<vmem>>) attributes {dimension_semantics = [#tpu.dimension_semantics<parallel>, #tpu.dimension_semantics<parallel>], iteration_bounds = array<i64: 1, 1>, scalar_prefetch = 0 : i64, scratch_operands = 0 : i64, tpu.core_type = #tpu.core_type<tc>, window_params = [{transform_indices = @transform_0, window_bounds = array<i64: 8, 128>}, {transform_indices = @transform_1, window_bounds = array<i64: 128, 64>}, {transform_indices = @transform_2, window_bounds = array<i64: 1, 64>}, {transform_indices = @transform_3, window_bounds = array<i64: 8, 64>}]} {
    %c0 = arith.constant 0 : index
    %c0_0 = arith.constant 0 : index
    %0 = vector.load %arg2[%c0, %c0_0] : memref<8x128xf32, #tpu.memory_space<vmem>>, vector<8x128xf32>
    %c0_1 = arith.constant 0 : index
    %c0_2 = arith.constant 0 : index
    %1 = vector.load %arg3[%c0_1, %c0_2] : memref<128x64xf32, #tpu.memory_space<vmem>>, vector<128x64xf32>
    %cst = arith.constant dense<0.000000e+00> : vector<8x64xf32>
    %2 = tpu.matmul %0, %1, %cst {dimension_numbers = #tpu.dot_dimension_numbers<[1], [0], [0], [1], [0, 0, 1, 1], [], []>} : vector<8x128xf32>, vector<128x64xf32>, vector<8x64xf32> -> vector<8x64xf32>
    %c0_3 = arith.constant 0 : index
    %c0_4 = arith.constant 0 : index
    %3 = vector.load %arg4[%c0_3, %c0_4] : memref<1x64xf32, #tpu.memory_space<vmem>>, vector<1x64xf32>
    %4 = vector.broadcast %3 : vector<1x64xf32> to vector<8x64xf32>
    %5 = arith.addf %2, %4 : vector<8x64xf32>
    %c0_5 = arith.constant 0 : index
    %c0_6 = arith.constant 0 : index
    %6 = vector.load %arg5[%c0_5, %c0_6] : memref<8x64xf32, #tpu.memory_space<vmem>>, vector<8x64xf32>
    tpu.vector_store %arg5[%c0_5, %c0_6], %5 {strides = array<i32>} : memref<8x64xf32, #tpu.memory_space<vmem>>, vector<8x64xf32>,
    return
  }
  func.func @transform_0(%arg0: i32, %arg1: i32) -> (i32, i32) {
    %c0_i32 = arith.constant 0 : i32
    %c0_i32_0 = arith.constant 0 : i32
    return %arg0, %c0_i32 : i32, i32
  }
  func.func @transform_1(%arg0: i32, %arg1: i32) -> (i32, i32) {
    %c0_i32 = arith.constant 0 : i32
    %c0_i32_0 = arith.constant 0 : i32
    return %c0_i32, %arg1 : i32, i32
  }
  func.func @transform_2(%arg0: i32, %arg1: i32) -> (i32, i32) {
    %c0_i32 = arith.constant 0 : i32
    %c0_i32_0 = arith.constant 0 : i32
    return %c0_i32, %arg1 : i32, i32
  }
  func.func @transform_3(%arg0: i32, %arg1: i32) -> (i32, i32) {
    %c0_i32 = arith.constant 0 : i32
    return %arg0, %arg1 : i32, i32
  }
}

</mosaic_0001>

<bundles_post_ra>
// kernel: tpu_custom_call.1
= control target key start
LH: loop header
LB: loop body
LE: loop exit
PB: predicated region body
PF: predicated region fallthrough
CT: control target
= control target key end

     0   :  { %v230_v3 = vmov 0.0|0.0   ;;  %vm231_vm0 = vmmov 0   ;;  %v232_v6 = vmov 0.0   ;;  %s320_s0 = inlined_call_operand.vmem [shape: f32[8,128], index: 0, kind: input, shape index: {}]   ;;  %s321_s1 = inlined_call_operand.vmem [shape: f32[128,64], index: 1, kind: input, shape index: {}]   ;;  %s322_s2 = inlined_call_operand.vmem [shape: f32[1,64], index: 2, kind: input, shape index: {}]   ;;  %s323_s3 = inlined_call_operand.hbm [shape: f32[8,64], index: 3, kind: output, shape index: {}]  }
   0x1   :  { %v16_v0 = vld [vmem:[%s321_s1] sm:$0xff]  ;;  %v17_v1 = vld [vmem:[%s321_s1 + $0x8] sm:$0xff]  ;;  %v18_v2 = vld [vmem:[%s321_s1 + $0x10] sm:$0xff]  ;;  %178 = vmatprep.subr.bf16.mxu0 %v230_v3  ;;  %175 = vmatprep.mubr.msk.f32.mxu0 %vm231_vm0, %v232_v6 }
   0x2   :  { %v179_v4 = vpack.c.bf16 %v17_v1, %v16_v0  ;;  %v19_v5 = vld [vmem:[%s321_s1 + $0x18] sm:$0xff]  ;;  %v20_v8 = vld [vmem:[%s321_s1 + $0x20] sm:$0xff]  ;;  %v21_v9 = vld [vmem:[%s321_s1 + $0x28] sm:$0xff] }
   0x3   :  { %v182_v7 = vpack.c.bf16 %v19_v5, %v18_v2 }
   0x4   :  { %180 = vmatpush3.bf16.msra.mxu0 %v179_v4 }
   0x5   :  { %181 = vmatprep.subr.bf16.mxu0 %v230_v3 }
   0x6   :  { %8 = vsyncpa [#allocation3], 0  ;;  %v185_v10 = vpack.c.bf16 %v21_v9, %v20_v8  ;;  %v22_v11 = vld [vmem:[%s321_s1 + $0x30] sm:$0xff]  ;;  %v23_v12 = vld [vmem:[%s321_s1 + $0x38] sm:$0xff]  ;;  %s233_s21 = smov [#allocation2]   ;;  %vm109_vm1 = vcmask 523264  }
   0x7   :  { %v188_v13 = vpack.c.bf16 %v23_v12, %v22_v11  ;;  %v24_v14 = vld [vmem:[%s321_s1 + $0x40] sm:$0xff]  ;;  %v25_v15 = vld [vmem:[%s321_s1 + $0x48] sm:$0xff]  ;;  %v26_v17 = vld [vmem:[%s321_s1 + $0x50] sm:$0xff]  ;;  %s117_s22 = sshll.u32 %s233_s21, 4  ;;  %s118_s22 = int_to_ptr.vmem [resolvable:$true] %s117_s22 }
   0x8   :  { %183 = vmatpush3.bf16.msra.mxu0 %v182_v7  ;;  %v191_v16 = vpack.c.bf16 %v25_v15, %v24_v14  ;;  %v27_v18 = vld [vmem:[%s321_s1 + $0x58] sm:$0xff]  ;;  %v28_v20 = vld [vmem:[%s321_s1 + $0x60] sm:$0xff]  ;;  %v29_v21 = vld [vmem:[%s321_s1 + $0x68] sm:$0xff]  ;;  %p211_p1 = scmp.lt.s32.totalorder %s118_s22, %s118_s22 }
   0x9   :  { %184 = vmatprep.subr.bf16.mxu0 %v230_v3  ;;  %v194_v19 = vpack.c.bf16 %v27_v18, %v26_v17  ;;  %v197_v22 = vpack.c.bf16 %v29_v21, %v28_v20  ;;  %v30_v23 = vld [vmem:[%s321_s1 + $0x70] sm:$0xff]  ;;  %v31_v24 = vld [vmem:[%s321_s1 + $0x78] sm:$0xff]  ;;  %v15_v26 = vld [vmem:[%s320_s0] sm:$0xff]  ;;  %s206_s1 = scalar_lea.vmem %s118_s22, 128 }
   0xa   :  { %v200_v25 = vpack.c.bf16 %v31_v24, %v30_v23  ;;  %v125_v27 = vld [vmem:[%s322_s2] ss:$0 sm:$0xff]  ;;  %p207_p0 = scmp.ne.s32.totalorder %s118_s22, %s206_s1  ;;  %p212_p2 = scmp.lt.s32.totalorder %s206_s1, %s206_s1 }
   0xc   :  { %186 = vmatpush3.bf16.msra.mxu0 %v185_v10  ;;  %p213_p3 = por %p212_p2, %p211_p1 }
   0xd   :  { %187 = vmatprep.subr.bf16.mxu0 %v230_v3 }
   0xe   :  { %p214_p4 = pnand %p213_p3, %p207_p0 }
  0x10   :  { %189 = vmatpush3.bf16.msra.mxu0 %v188_v13 }
  0x11   :  { %190 = vmatprep.subr.bf16.mxu0 %v230_v3 }
  0x14   :  { %192 = vmatpush3.bf16.msra.mxu0 %v191_v16 }
  0x15   :  { %193 = vmatprep.subr.bf16.mxu0 %v230_v3 }
  0x18   :  { %195 = vmatpush3.bf16.msra.mxu0 %v194_v19 }
  0x19   :  { %196 = vmatprep.subr.bf16.mxu0 %v230_v3 }
  0x1c   :  { %198 = vmatpush3.bf16.msra.mxu0 %v197_v22 }
  0x1d   :  { %199 = vmatprep.subr.bf16.mxu0 %v230_v3 }
  0x20   :  { %201 = vmatpush3.bf16.msra.mxu0 %v200_v25 }
  0x23   :  { %176 = vmatmul.mubr.f32.vlgmr.msra.gmra.mrb[0].mxu0 %v15_v26 }
  0xf6   :  { %v105_v28 = vpop.f32.mrb[0].mxu0 }
  0xf7   :  { %v106_v29 = vadd.f32 %v125_v27, %v105_v28  ;;  %v177_v30 = vpop.f32.mrb[1].mxu0 }
  0xf9   :  { %110 = vst.msk [vmem:[#allocation2] sm:$0xff] %vm109_vm1, %v106_v29 }
  0xfa   :  { %217 = shalt.err (!%p214_p4)
}
  0xfb   :  { %s218_s24 = scalar_lea.hbm %s323_s3, 128 }
  0xfc   :  { %p219_p5 = scmp.ne.s32.totalorder %s323_s3, %s218_s24  ;;  %p222_p6 = scmp.lt.u32.totalorder %s218_s24, %s323_s3 }
  0xfe   :  { %p224_p7 = pnand %p222_p6, %p219_p5 }
 0x100   :  { %227 = shalt.err (!%p224_p7)
}
 0x101   :  { %120 = dma.vmem_to_hbm [thread:$0]  %s118_s22, 128, %s323_s3, [#allocation3]  }
 0x102   :  { %228 = dma.done.wait [#allocation3], 128  }
 0x103   :  { %229 = vsyncadd [#allocation3], 4294967168 }
 0x104   :  { %124 = vsyncpa [#allocation3], 1 }

</bundles_post_ra>
